<compile_context>
chip_gen: v7x
topology: tpu7x:2x2x1
jax: 0.10.0
libtpu: 0.0.40
codegen_flags: <defaults>
</compile_context>

<pallas_src>
import functools
import math

import jax
import jax.numpy as jnp
from jax import lax
from jax.experimental import pallas as pl
from jax.experimental.pallas import tpu as pltpu


def _wsmqa_kernel(x_q_ref, x_kv_ref, w_q_ref, b_q_ref, w_kv_ref, b_kv_ref,
                  w_out_ref, b_out_ref, o_ref,
                  q_scr, m_scr, l_scr, acc_scr,
                  *, n_heads, d_head, block_q, block_kv):
    """One (batch, q_tile) worth of work; kv tiles stream over the last grid axis.

    x_q_ref:   (1, block_q,  d_model)   bf16
    x_kv_ref:  (1, block_kv, d_model)   bf16
    w_q_ref:   (d_model, d_model)       bf16
    b_q_ref:   (1, d_model)             f32
    w_kv_ref:  (d_model, 2*d_head)      bf16
    b_kv_ref:  (1, 2*d_head)            f32
    w_out_ref: (d_model, d_model)       bf16
    b_out_ref: (1, d_model)             f32
    o_ref:     (1, block_q, d_model)    output dtype
    q_scr:     (n_heads*block_q, d_head) bf16   (head-major row blocks)
    m_scr/l_scr: (n_heads*block_q, 1)   f32
    acc_scr:   (n_heads*block_q, d_head) f32
    """
    qi = pl.program_id(1)
    ki = pl.program_id(2)
    num_kv = pl.num_programs(2)
    scale = 1.0 / math.sqrt(d_head)

    # ---- q-tile prologue: QKV(q) projection + accumulator init (once per q tile)
    @pl.when(ki == 0)
    def _init():
        xq = x_q_ref[0]                                            # (Tq, D) bf16
        qp = jnp.dot(xq, w_q_ref[...], preferred_element_type=jnp.float32)
        qp = (qp + b_q_ref[...]) * scale                           # pre-scaled q, f32
        # Head-major row blocks: rows [h*Tq, (h+1)*Tq) hold head h.
        for h in range(n_heads):
            q_scr[h * block_q:(h + 1) * block_q, :] = (
                qp[:, h * d_head:(h + 1) * d_head].astype(q_scr.dtype))
        m_scr[...] = jnp.full(m_scr.shape, -jnp.inf, dtype=m_scr.dtype)
        l_scr[...] = jnp.zeros(l_scr.shape, dtype=l_scr.dtype)
        acc_scr[...] = jnp.zeros(acc_scr.shape, dtype=acc_scr.dtype)

    # ---- online-softmax update; skip kv tiles that are entirely in the future
    @pl.when(ki * block_kv <= qi * block_q + (block_q - 1))
    def _compute():
        xkv = x_kv_ref[0]                                          # (Tk, D) bf16
        kv = jnp.dot(xkv, w_kv_ref[...], preferred_element_type=jnp.float32)
        kv = kv + b_kv_ref[...]                                    # (Tk, 2*dh) f32
        k = kv[:, :d_head].astype(jnp.bfloat16)                    # shared across heads
        v = kv[:, d_head:].astype(jnp.bfloat16)

        q_rows = q_scr[...]                                        # (H*Tq, dh) bf16
        # One MXU contraction for all heads: q @ k^T (contract last dims).
        s = lax.dot_general(q_rows, k, (((1,), (1,)), ((), ())),
                            preferred_element_type=jnp.float32)    # (H*Tq, Tk) f32

        # Causal mask built per (Tq, Tk) tile from global positions, replicated
        # over the head-major row blocks as an additive f32 bias.
        q_pos = qi * block_q + lax.broadcasted_iota(jnp.int32, (block_q, block_kv), 0)
        k_pos = ki * block_kv + lax.broadcasted_iota(jnp.int32, (block_q, block_kv), 1)
        bias = jnp.where(q_pos >= k_pos, 0.0, -1e30).astype(jnp.float32)
        s = s + jnp.concatenate([bias] * n_heads, axis=0)

        m_prev = m_scr[...]
        m_new = jnp.maximum(m_prev, jnp.max(s, axis=-1, keepdims=True))
        alpha = jnp.exp(m_prev - m_new)
        p = jnp.exp(s - m_new)                                     # f32
        l_scr[...] = alpha * l_scr[...] + jnp.sum(p, axis=-1, keepdims=True)
        acc_scr[...] = alpha * acc_scr[...] + jnp.dot(
            p.astype(jnp.bfloat16), v, preferred_element_type=jnp.float32)
        m_scr[...] = m_new

    # ---- epilogue: normalize, concat heads, fused output projection
    @pl.when(ki == num_kv - 1)
    def _finalize():
        inv_l = pl.reciprocal(l_scr[...], approx=True)             # EUP slot
        out_rows = acc_scr[...] * inv_l                            # (H*Tq, dh) f32
        # head-major row blocks -> (Tq, H*dh), matching the PyTorch rearrange.
        concat = jnp.concatenate(
            [out_rows[h * block_q:(h + 1) * block_q, :] for h in range(n_heads)],
            axis=-1)                                               # (Tq, d_model)
        out = jnp.dot(concat.astype(jnp.bfloat16), w_out_ref[...],
                      preferred_element_type=jnp.float32)
        out = out + b_out_ref[...]
        o_ref[0] = out.astype(o_ref.dtype)


def ws_multi_query_attention(x, w_qkv, b_qkv, w_out, b_out, *,
                             n_heads, d_head, block_q=None):
    """Forward pass of WSMultiQueryAttention.

    x:      (B, S, d_model)
    w_qkv:  (d_model, d_model + 2*d_head)   b_qkv: (d_model + 2*d_head,)
    w_out:  (d_model, d_model)              b_out: (d_model,)
    """
    B, S, d_model = x.shape
    d_kv = 2 * d_head
    assert d_model == n_heads * d_head
    assert w_qkv.shape == (d_model, d_model + d_kv)

    orig_dtype = x.dtype
    cdt = jnp.bfloat16
    # bf16 operands at the pallas_call boundary (halves weight HBM/VMEM traffic);
    # biases stay f32 (added to the f32 accumulators).
    x_c = x.astype(cdt)
    w_q = w_qkv[:, :d_model].astype(cdt)
    w_kv = w_qkv[:, d_model:].astype(cdt)
    w_o = w_out.astype(cdt)
    b_q = b_qkv[:d_model].reshape(1, d_model).astype(jnp.float32)
    b_kv = b_qkv[d_model:].reshape(1, d_kv).astype(jnp.float32)
    b_o = b_out.reshape(1, d_model).astype(jnp.float32)

    if block_q is None:
        block_q = S if S <= 128 else 128
    block_kv = block_q
    assert S % block_q == 0  # TODO(synk): pad/mask ragged sequence lengths
    n_q = S // block_q
    n_kv = S // block_kv

    kernel = functools.partial(_wsmqa_kernel, n_heads=n_heads, d_head=d_head,
                               block_q=block_q, block_kv=block_kv)

    grid_spec = pltpu.PrefetchScalarGridSpec(
        num_scalar_prefetch=0,
        grid=(B, n_q, n_kv),
        in_specs=[
            pl.BlockSpec((1, block_q, d_model), lambda b, qi, ki: (b, qi, 0)),   # x (q tile)
            pl.BlockSpec((1, block_kv, d_model), lambda b, qi, ki: (b, ki, 0)),  # x (kv tile)
            pl.BlockSpec((d_model, d_model), lambda b, qi, ki: (0, 0)),          # W_q
            pl.BlockSpec((1, d_model), lambda b, qi, ki: (0, 0)),                # b_q
            pl.BlockSpec((d_model, d_kv), lambda b, qi, ki: (0, 0)),             # W_kv
            pl.BlockSpec((1, d_kv), lambda b, qi, ki: (0, 0)),                   # b_kv
            pl.BlockSpec((d_model, d_model), lambda b, qi, ki: (0, 0)),          # W_out
            pl.BlockSpec((1, d_model), lambda b, qi, ki: (0, 0)),                # b_out
        ],
        out_specs=pl.BlockSpec((1, block_q, d_model), lambda b, qi, ki: (b, qi, 0)),
        scratch_shapes=[
            pltpu.VMEM((n_heads * block_q, d_head), jnp.bfloat16),   # folded q rows
            pltpu.VMEM((n_heads * block_q, 1), jnp.float32),         # running max
            pltpu.VMEM((n_heads * block_q, 1), jnp.float32),         # running sum
            pltpu.VMEM((n_heads * block_q, d_head), jnp.float32),    # output accum
        ],
    )

    return pl.pallas_call(
        kernel,
        out_shape=jax.ShapeDtypeStruct((B, S, d_model), orig_dtype),
        grid_spec=grid_spec,
        compiler_params=pltpu.CompilerParams(
            dimension_semantics=("parallel", "parallel", "arbitrary"),
            vmem_limit_bytes=48 * 1024 * 1024),
    )(x_c, x_c, w_q, b_q, w_kv, b_kv, w_o, b_o)


def reference(x, w_qkv, b_qkv, w_out, b_out, *, n_heads, d_head):
    """Pure-JAX f32 reference matching the PyTorch forward."""
    B, S, d_model = x.shape
    qkv = x @ w_qkv + b_qkv[None, None, :]
    q, k, v = (qkv[..., :d_model],
               qkv[..., d_model:d_model + d_head],
               qkv[..., d_model + d_head:])
    q = q.reshape(B, S, n_heads, d_head).transpose(0, 2, 1, 3)      # (B,H,S,dh)
    k = jnp.broadcast_to(k[:, None, :, :], (B, n_heads, S, d_head))
    v = jnp.broadcast_to(v[:, None, :, :], (B, n_heads, S, d_head))
    scale = 1.0 / math.sqrt(d_head)
    scores = jnp.einsum("bhqd,bhkd->bhqk", q, k) * scale
    mask = jnp.tril(jnp.ones((S, S), dtype=bool))
    scores = jnp.where(mask[None, None], scores, -jnp.inf)
    probs = jax.nn.softmax(scores, axis=-1)
    attn = jnp.einsum("bhqk,bhkd->bhqd", probs, v)                  # (B,H,S,dh)
    concat = attn.transpose(0, 2, 1, 3).reshape(B, S, d_model)
    return concat @ w_out + b_out[None, None, :]


if __name__ == "__main__":
    # Small shapes consistent with the module: d_model = n_heads * d_head.
    batch, seq, n_heads, d_head = 2, 8, 4, 8
    d_model = n_heads * d_head            # 32
    d_qkv = d_model + 2 * d_head          # 48

    key = jax.random.PRNGKey(0)
    kx, k1, k2, k3, k4 = jax.random.split(key, 5)

    x = jax.random.normal(kx, (batch, seq, d_model), dtype=jnp.float32)

    # Deterministic "Linear" parameters (stored as [in, out]).
    bound = 1.0 / math.sqrt(d_model)
    w_qkv = jax.random.uniform(k1, (d_model, d_qkv), jnp.float32, -bound, bound)
    b_qkv = jax.random.uniform(k2, (d_qkv,), jnp.float32, -bound, bound)
    w_out = jax.random.uniform(k3, (d_model, d_model), jnp.float32, -bound, bound)
    b_out = jax.random.uniform(k4, (d_model,), jnp.float32, -bound, bound)

    out = ws_multi_query_attention(x, w_qkv, b_qkv, w_out, b_out,
                                   n_heads=n_heads, d_head=d_head)
    out = jax.block_until_ready(out)

    ref = reference(x, w_qkv, b_qkv, w_out, b_out,
                    n_heads=n_heads, d_head=d_head)
    assert out.shape == (batch, seq, d_model)
    # bf16 MXU operands -> compare against the f32 reference at bf16 tolerance.
    max_err = jnp.max(jnp.abs(out - ref))
    assert jnp.allclose(out, ref, atol=3e-2, rtol=3e-2), f"max err = {max_err}"

    print("KERNEL_OK")
</pallas_src>

<mosaic_0001>
module attributes {stable_mosaic.version = 11 : i64} {
  func.func @_wsmqa_kernel(%arg0: i32, %arg1: i32, %arg2: i32, %arg3: memref<1x8x32xbf16, #tpu.memory_space<vmem>>, %arg4: memref<1x8x32xbf16, #tpu.memory_space<vmem>>, %arg5: memref<32x32xbf16, #tpu.memory_space<vmem>>, %arg6: memref<1x32xf32, #tpu.memory_space<vmem>>, %arg7: memref<32x16xbf16, #tpu.memory_space<vmem>>, %arg8: memref<1x16xf32, #tpu.memory_space<vmem>>, %arg9: memref<32x32xbf16, #tpu.memory_space<vmem>>, %arg10: memref<1x32xf32, #tpu.memory_space<vmem>>, %arg11: memref<1x8x32xf32, #tpu.memory_space<vmem>>, %arg12: memref<32x8xbf16, #tpu.memory_space<vmem>>, %arg13: memref<32x1xf32, #tpu.memory_space<vmem>>, %arg14: memref<32x1xf32, #tpu.memory_space<vmem>>, %arg15: memref<32x8xf32, #tpu.memory_space<vmem>>) attributes {dimension_semantics = [#tpu.dimension_semantics<parallel>, #tpu.dimension_semantics<parallel>, #tpu.dimension_semantics<arbitrary>], iteration_bounds = array<i64: 2, 1, 1>, scalar_prefetch = 0 : i64, scratch_operands = 4 : i64, tpu.core_type = #tpu.core_type<tc>, window_params = [{transform_indices = @transform_0, window_bounds = array<i64: 1, 8, 32>}, {transform_indices = @transform_1, window_bounds = array<i64: 1, 8, 32>}, {pipeline_mode = #tpu.pipeline_mode<synchronous>, transform_indices = @transform_2, window_bounds = array<i64: 32, 32>}, {pipeline_mode = #tpu.pipeline_mode<synchronous>, transform_indices = @transform_3, window_bounds = array<i64: 1, 32>}, {pipeline_mode = #tpu.pipeline_mode<synchronous>, transform_indices = @transform_4, window_bounds = array<i64: 32, 16>}, {pipeline_mode = #tpu.pipeline_mode<synchronous>, transform_indices = @transform_5, window_bounds = array<i64: 1, 16>}, {pipeline_mode = #tpu.pipeline_mode<synchronous>, transform_indices = @transform_6, window_bounds = array<i64: 32, 32>}, {pipeline_mode = #tpu.pipeline_mode<synchronous>, transform_indices = @transform_7, window_bounds = array<i64: 1, 32>}, {transform_indices = @transform_8, window_bounds = array<i64: 1, 8, 32>}]} {
    %c0_i32 = arith.constant 0 : i32
    %0 = arith.cmpi eq, %arg2, %c0_i32 : i32
    %1 = arith.extui %0 : i1 to i32
    %c0_i32_0 = arith.constant 0 : i32
    %2 = arith.cmpi ne, %1, %c0_i32_0 : i32
    scf.if %2 {
      %c0 = arith.constant 0 : index
      %c0_5 = arith.constant 0 : index
      %c0_6 = arith.constant 0 : index
      %12 = vector.load %arg3[%c0, %c0_5, %c0_6] : memref<1x8x32xbf16, #tpu.memory_space<vmem>>, vector<1x8x32xbf16>
      %13 = vector.shape_cast %12 : vector<1x8x32xbf16> to vector<8x32xbf16>
      %c0_7 = arith.constant 0 : index
      %c0_8 = arith.constant 0 : index
      %14 = vector.load %arg5[%c0_7, %c0_8] : memref<32x32xbf16, #tpu.memory_space<vmem>>, vector<32x32xbf16>
      %cst = arith.constant dense<0.000000e+00> : vector<8x32xf32>
      %15 = tpu.matmul %13, %14, %cst {dimension_numbers = #tpu.dot_dimension_numbers<[1], [0], [0], [1], [0, 0, 1, 1], [], []>} : vector<8x32xbf16>, vector<32x32xbf16>, vector<8x32xf32> -> vector<8x32xf32>
      %c0_9 = arith.constant 0 : index
      %c0_10 = arith.constant 0 : index
      %16 = vector.load %arg6[%c0_9, %c0_10] : memref<1x32xf32, #tpu.memory_space<vmem>>, vector<1x32xf32>
      %17 = vector.broadcast %16 : vector<1x32xf32> to vector<8x32xf32>
      %18 = arith.addf %15, %17 : vector<8x32xf32>
      %cst_11 = arith.constant 0.353553385 : f32
      %19 = vector.broadcast %cst_11 : f32 to vector<8x32xf32>
      %20 = arith.mulf %18, %19 : vector<8x32xf32>
      %21 = vector.extract_strided_slice %20 {offsets = [0, 0], sizes = [8, 8], strides = [1, 1]} : vector<8x32xf32> to vector<8x8xf32>
      %22 = arith.truncf %21 : vector<8x8xf32> to vector<8x8xbf16>
      %c0_12 = arith.constant 0 : index
      %c0_13 = arith.constant 0 : index
      %23 = vector.load %arg12[%c0_12, %c0_13] : memref<32x8xbf16, #tpu.memory_space<vmem>>, vector<8x8xbf16>
      tpu.vector_store %arg12[%c0_12, %c0_13], %22 {strides = array<i32>} : memref<32x8xbf16, #tpu.memory_space<vmem>>, vector<8x8xbf16>,
      %24 = vector.extract_strided_slice %20 {offsets = [0, 8], sizes = [8, 8], strides = [1, 1]} : vector<8x32xf32> to vector<8x8xf32>
      %25 = arith.truncf %24 : vector<8x8xf32> to vector<8x8xbf16>
      %c8 = arith.constant 8 : index
      %c0_14 = arith.constant 0 : index
      %26 = vector.load %arg12[%c8, %c0_14] : memref<32x8xbf16, #tpu.memory_space<vmem>>, vector<8x8xbf16>
      tpu.vector_store %arg12[%c8, %c0_14], %25 {strides = array<i32>} : memref<32x8xbf16, #tpu.memory_space<vmem>>, vector<8x8xbf16>,
      %27 = vector.extract_strided_slice %20 {offsets = [0, 16], sizes = [8, 8], strides = [1, 1]} : vector<8x32xf32> to vector<8x8xf32>
      %28 = arith.truncf %27 : vector<8x8xf32> to vector<8x8xbf16>
      %c16 = arith.constant 16 : index
      %c0_15 = arith.constant 0 : index
      %29 = vector.load %arg12[%c16, %c0_15] : memref<32x8xbf16, #tpu.memory_space<vmem>>, vector<8x8xbf16>
      tpu.vector_store %arg12[%c16, %c0_15], %28 {strides = array<i32>} : memref<32x8xbf16, #tpu.memory_space<vmem>>, vector<8x8xbf16>,
      %30 = vector.extract_strided_slice %20 {offsets = [0, 24], sizes = [8, 8], strides = [1, 1]} : vector<8x32xf32> to vector<8x8xf32>
      %31 = arith.truncf %30 : vector<8x8xf32> to vector<8x8xbf16>
      %c24 = arith.constant 24 : index
      %c0_16 = arith.constant 0 : index
      %32 = vector.load %arg12[%c24, %c0_16] : memref<32x8xbf16, #tpu.memory_space<vmem>>, vector<8x8xbf16>
      tpu.vector_store %arg12[%c24, %c0_16], %31 {strides = array<i32>} : memref<32x8xbf16, #tpu.memory_space<vmem>>, vector<8x8xbf16>,
      %cst_17 = arith.constant 0xFF800000 : f32
      %33 = vector.broadcast %cst_17 : f32 to vector<32x1xf32>
      %c0_18 = arith.constant 0 : index
      %c0_19 = arith.constant 0 : index
      %34 = vector.load %arg13[%c0_18, %c0_19] : memref<32x1xf32, #tpu.memory_space<vmem>>, vector<32x1xf32>
      tpu.vector_store %arg13[%c0_18, %c0_19], %33 {strides = array<i32>} : memref<32x1xf32, #tpu.memory_space<vmem>>, vector<32x1xf32>,
      %cst_20 = arith.constant 0.000000e+00 : f32
      %35 = vector.broadcast %cst_20 : f32 to vector<32x1xf32>
      %c0_21 = arith.constant 0 : index
      %c0_22 = arith.constant 0 : index
      %36 = vector.load %arg14[%c0_21, %c0_22] : memref<32x1xf32, #tpu.memory_space<vmem>>, vector<32x1xf32>
      tpu.vector_store %arg14[%c0_21, %c0_22], %35 {strides = array<i32>} : memref<32x1xf32, #tpu.memory_space<vmem>>, vector<32x1xf32>,
      %cst_23 = arith.constant 0.000000e+00 : f32
      %37 = vector.broadcast %cst_23 : f32 to vector<32x8xf32>
      %c0_24 = arith.constant 0 : index
      %c0_25 = arith.constant 0 : index
      %38 = vector.load %arg15[%c0_24, %c0_25] : memref<32x8xf32, #tpu.memory_space<vmem>>, vector<32x8xf32>
      tpu.vector_store %arg15[%c0_24, %c0_25], %37 {strides = array<i32>} : memref<32x8xf32, #tpu.memory_space<vmem>>, vector<32x8xf32>,
    } else {
    }
    %c8_i32 = arith.constant 8 : i32
    %3 = arith.muli %arg2, %c8_i32 : i32
    %c8_i32_1 = arith.constant 8 : i32
    %4 = arith.muli %arg1, %c8_i32_1 : i32
    %c7_i32 = arith.constant 7 : i32
    %5 = arith.addi %4, %c7_i32 : i32
    %6 = arith.cmpi sle, %3, %5 : i32
    %7 = arith.extui %6 : i1 to i32
    %c0_i32_2 = arith.constant 0 : i32
    %8 = arith.cmpi ne, %7, %c0_i32_2 : i32
    scf.if %8 {
      %c0 = arith.constant 0 : index
      %c0_5 = arith.constant 0 : index
      %c0_6 = arith.constant 0 : index
      %12 = vector.load %arg4[%c0, %c0_5, %c0_6] : memref<1x8x32xbf16, #tpu.memory_space<vmem>>, vector<1x8x32xbf16>
      %13 = vector.shape_cast %12 : vector<1x8x32xbf16> to vector<8x32xbf16>
      %c0_7 = arith.constant 0 : index
      %c0_8 = arith.constant 0 : index
      %14 = vector.load %arg7[%c0_7, %c0_8] : memref<32x16xbf16, #tpu.memory_space<vmem>>, vector<32x16xbf16>
      %cst = arith.constant dense<0.000000e+00> : vector<8x16xf32>
      %15 = tpu.matmul %13, %14, %cst {dimension_numbers = #tpu.dot_dimension_numbers<[1], [0], [0], [1], [0, 0, 1, 1], [], []>} : vector<8x32xbf16>, vector<32x16xbf16>, vector<8x16xf32> -> vector<8x16xf32>
      %c0_9 = arith.constant 0 : index
      %c0_10 = arith.constant 0 : index
      %16 = vector.load %arg8[%c0_9, %c0_10] : memref<1x16xf32, #tpu.memory_space<vmem>>, vector<1x16xf32>
      %17 = vector.broadcast %16 : vector<1x16xf32> to vector<8x16xf32>
      %18 = arith.addf %15, %17 : vector<8x16xf32>
      %19 = vector.extract_strided_slice %18 {offsets = [0, 0], sizes = [8, 8], strides = [1, 1]} : vector<8x16xf32> to vector<8x8xf32>
      %20 = arith.truncf %19 : vector<8x8xf32> to vector<8x8xbf16>
      %21 = vector.extract_strided_slice %18 {offsets = [0, 8], sizes = [8, 8], strides = [1, 1]} : vector<8x16xf32> to vector<8x8xf32>
      %22 = arith.truncf %21 : vector<8x8xf32> to vector<8x8xbf16>
      %c0_11 = arith.constant 0 : index
      %c0_12 = arith.constant 0 : index
      %23 = vector.load %arg12[%c0_11, %c0_12] : memref<32x8xbf16, #tpu.memory_space<vmem>>, vector<32x8xbf16>
      %cst_13 = arith.constant dense<0.000000e+00> : vector<32x8xf32>
      %24 = tpu.matmul %23, %20, %cst_13 {dimension_numbers = #tpu.dot_dimension_numbers<[1], [1], [0], [0], [0, 0, 1, 0], [], []>} : vector<32x8xbf16>, vector<8x8xbf16>, vector<32x8xf32> -> vector<32x8xf32>
      %c8_i32_14 = arith.constant 8 : i32
      %25 = arith.muli %arg1, %c8_i32_14 : i32
      %26 = tpu.iota {dimensions = array<i32: 0>} : vector<8x8xi32>
      %27 = vector.broadcast %25 : i32 to vector<8x8xi32>
      %28 = arith.addi %27, %26 : vector<8x8xi32>
      %c8_i32_15 = arith.constant 8 : i32
      %29 = arith.muli %arg2, %c8_i32_15 : i32
      %30 = tpu.iota {dimensions = array<i32: 1>} : vector<8x8xi32>
      %31 = vector.broadcast %29 : i32 to vector<8x8xi32>
      %32 = arith.addi %31, %30 : vector<8x8xi32>
      %33 = arith.cmpi sge, %28, %32 : vector<8x8xi32>
      %cst_16 = arith.constant 0.000000e+00 : f32
      %cst_17 = arith.constant -1.000000e+30 : f32
      %34 = vector.broadcast %cst_16 : f32 to vector<8x8xf32>
      %35 = vector.broadcast %cst_17 : f32 to vector<8x8xf32>
      %36 = arith.select %33, %34, %35 : vector<8x8xi1>, vector<8x8xf32>
      %37 = tpu.concatenate %36, %36, %36, %36 in 0 : vector<8x8xf32>, vector<8x8xf32>, vector<8x8xf32>, vector<8x8xf32> -> vector<32x8xf32>
      %38 = arith.addf %24, %37 : vector<32x8xf32>
      %c0_18 = arith.constant 0 : index
      %c0_19 = arith.constant 0 : index
      %39 = vector.load %arg13[%c0_18, %c0_19] : memref<32x1xf32, #tpu.memory_space<vmem>>, vector<32x1xf32>
      %cst_20 = arith.constant dense<0xFF800000> : vector<32xf32>
      %40 = vector.multi_reduction <maximumf>, %38, %cst_20 [1] : vector<32x8xf32> to vector<32xf32>
      %41 = vector.shape_cast %40 : vector<32xf32> to vector<32x1xf32>
      %42 = arith.maximumf %39, %41 : vector<32x1xf32>
      %43 = arith.subf %39, %42 : vector<32x1xf32>
      %44 = math.exp %43 : vector<32x1xf32>
      %45 = vector.broadcast %42 : vector<32x1xf32> to vector<32x8xf32>
      %46 = arith.subf %38, %45 : vector<32x8xf32>
      %47 = math.exp %46 : vector<32x8xf32>
      %c0_21 = arith.constant 0 : index
      %c0_22 = arith.constant 0 : index
      %48 = vector.load %arg14[%c0_21, %c0_22] : memref<32x1xf32, #tpu.memory_space<vmem>>, vector<32x1xf32>
      %49 = arith.mulf %44, %48 : vector<32x1xf32>
      %cst_23 = arith.constant dense<0.000000e+00> : vector<32xf32>
      %50 = vector.multi_reduction <add>, %47, %cst_23 [1] : vector<32x8xf32> to vector<32xf32>
      %51 = vector.shape_cast %50 : vector<32xf32> to vector<32x1xf32>
      %52 = arith.addf %49, %51 : vector<32x1xf32>
      %c0_24 = arith.constant 0 : index
      %c0_25 = arith.constant 0 : index
      %53 = vector.load %arg14[%c0_24, %c0_25] : memref<32x1xf32, #tpu.memory_space<vmem>>, vector<32x1xf32>
      tpu.vector_store %arg14[%c0_24, %c0_25], %52 {strides = array<i32>} : memref<32x1xf32, #tpu.memory_space<vmem>>, vector<32x1xf32>,
      %c0_26 = arith.constant 0 : index
      %c0_27 = arith.constant 0 : index
      %54 = vector.load %arg15[%c0_26, %c0_27] : memref<32x8xf32, #tpu.memory_space<vmem>>, vector<32x8xf32>
      %55 = vector.broadcast %44 : vector<32x1xf32> to vector<32x8xf32>
      %56 = arith.mulf %55, %54 : vector<32x8xf32>
      %57 = arith.truncf %47 : vector<32x8xf32> to vector<32x8xbf16>
      %cst_28 = arith.constant dense<0.000000e+00> : vector<32x8xf32>
      %58 = tpu.matmul %57, %22, %cst_28 {dimension_numbers = #tpu.dot_dimension_numbers<[1], [0], [0], [1], [0, 0, 1, 1], [], []>} : vector<32x8xbf16>, vector<8x8xbf16>, vector<32x8xf32> -> vector<32x8xf32>
      %59 = arith.addf %56, %58 : vector<32x8xf32>
      %c0_29 = arith.constant 0 : index
      %c0_30 = arith.constant 0 : index
      %60 = vector.load %arg15[%c0_29, %c0_30] : memref<32x8xf32, #tpu.memory_space<vmem>>, vector<32x8xf32>
      tpu.vector_store %arg15[%c0_29, %c0_30], %59 {strides = array<i32>} : memref<32x8xf32, #tpu.memory_space<vmem>>, vector<32x8xf32>,
      %c0_31 = arith.constant 0 : index
      %c0_32 = arith.constant 0 : index
      %61 = vector.load %arg13[%c0_31, %c0_32] : memref<32x1xf32, #tpu.memory_space<vmem>>, vector<32x1xf32>
      tpu.vector_store %arg13[%c0_31, %c0_32], %42 {strides = array<i32>} : memref<32x1xf32, #tpu.memory_space<vmem>>, vector<32x1xf32>,
    } else {
    }
    %c0_i32_3 = arith.constant 0 : i32
    %9 = arith.cmpi eq, %arg2, %c0_i32_3 : i32
    %10 = arith.extui %9 : i1 to i32
    %c0_i32_4 = arith.constant 0 : i32
    %11 = arith.cmpi ne, %10, %c0_i32_4 : i32
    scf.if %11 {
      %c0 = arith.constant 0 : index
      %c0_5 = arith.constant 0 : index
      %12 = vector.load %arg14[%c0, %c0_5] : memref<32x1xf32, #tpu.memory_space<vmem>>, vector<32x1xf32>
      %13 = tpu.reciprocal %12 {approx = true} : vector<32x1xf32> -> vector<32x1xf32>
      %c0_6 = arith.constant 0 : index
      %c0_7 = arith.constant 0 : index
      %14 = vector.load %arg15[%c0_6, %c0_7] : memref<32x8xf32, #tpu.memory_space<vmem>>, vector<32x8xf32>
      %15 = vector.broadcast %13 : vector<32x1xf32> to vector<32x8xf32>
      %16 = arith.mulf %14, %15 : vector<32x8xf32>
      %17 = vector.extract_strided_slice %16 {offsets = [0, 0], sizes = [8, 8], strides = [1, 1]} : vector<32x8xf32> to vector<8x8xf32>
      %18 = vector.extract_strided_slice %16 {offsets = [8, 0], sizes = [8, 8], strides = [1, 1]} : vector<32x8xf32> to vector<8x8xf32>
      %19 = vector.extract_strided_slice %16 {offsets = [16, 0], sizes = [8, 8], strides = [1, 1]} : vector<32x8xf32> to vector<8x8xf32>
      %20 = vector.extract_strided_slice %16 {offsets = [24, 0], sizes = [8, 8], strides = [1, 1]} : vector<32x8xf32> to vector<8x8xf32>
      %21 = tpu.concatenate %17, %18, %19, %20 in 1 : vector<8x8xf32>, vector<8x8xf32>, vector<8x8xf32>, vector<8x8xf32> -> vector<8x32xf32>
      %22 = arith.truncf %21 : vector<8x32xf32> to vector<8x32xbf16>
      %c0_8 = arith.constant 0 : index
      %c0_9 = arith.constant 0 : index
      %23 = vector.load %arg9[%c0_8, %c0_9] : memref<32x32xbf16, #tpu.memory_space<vmem>>, vector<32x32xbf16>
      %cst = arith.constant dense<0.000000e+00> : vector<8x32xf32>
      %24 = tpu.matmul %22, %23, %cst {dimension_numbers = #tpu.dot_dimension_numbers<[1], [0], [0], [1], [0, 0, 1, 1], [], []>} : vector<8x32xbf16>, vector<32x32xbf16>, vector<8x32xf32> -> vector<8x32xf32>
      %c0_10 = arith.constant 0 : index
      %c0_11 = arith.constant 0 : index
      %25 = vector.load %arg10[%c0_10, %c0_11] : memref<1x32xf32, #tpu.memory_space<vmem>>, vector<1x32xf32>
      %26 = vector.broadcast %25 : vector<1x32xf32> to vector<8x32xf32>
      %27 = arith.addf %24, %26 : vector<8x32xf32>
      %c0_12 = arith.constant 0 : index
      %c0_13 = arith.constant 0 : index
      %c0_14 = arith.constant 0 : index
      %28 = vector.load %arg11[%c0_12, %c0_13, %c0_14] : memref<1x8x32xf32, #tpu.memory_space<vmem>>, vector<1x8x32xf32>
      %29 = vector.shape_cast %28 : vector<1x8x32xf32> to vector<8x32xf32>
      %30 = vector.shape_cast %27 : vector<8x32xf32> to vector<1x8x32xf32>
      tpu.vector_store %arg11[%c0_12, %c0_13, %c0_14], %30 {strides = array<i32>} : memref<1x8x32xf32, #tpu.memory_space<vmem>>, vector<1x8x32xf32>,
    } else {
    }
    return
  }
  func.func @transform_0(%arg0: i32, %arg1: i32, %arg2: i32) -> (i32, i32, i32) {
    %c0_i32 = arith.constant 0 : i32
    %c0_i32_0 = arith.constant 0 : i32
    return %arg0, %arg1, %c0_i32 : i32, i32, i32
  }
  func.func @transform_1(%arg0: i32, %arg1: i32, %arg2: i32) -> (i32, i32, i32) {
    %c0_i32 = arith.constant 0 : i32
    %c0_i32_0 = arith.constant 0 : i32
    return %arg0, %arg2, %c0_i32 : i32, i32, i32
  }
  func.func @transform_2(%arg0: i32, %arg1: i32, %arg2: i32) -> (i32, i32) {
    %c0_i32 = arith.constant 0 : i32
    %c0_i32_0 = arith.constant 0 : i32
    %c0_i32_1 = arith.constant 0 : i32
    return %c0_i32, %c0_i32_0 : i32, i32
  }
  func.func @transform_3(%arg0: i32, %arg1: i32, %arg2: i32) -> (i32, i32) {
    %c0_i32 = arith.constant 0 : i32
    %c0_i32_0 = arith.constant 0 : i32
    %c0_i32_1 = arith.constant 0 : i32
    return %c0_i32, %c0_i32_0 : i32, i32
  }
  func.func @transform_4(%arg0: i32, %arg1: i32, %arg2: i32) -> (i32, i32) {
    %c0_i32 = arith.constant 0 : i32
    %c0_i32_0 = arith.constant 0 : i32
    %c0_i32_1 = arith.constant 0 : i32
    return %c0_i32, %c0_i32_0 : i32, i32
  }
  func.func @transform_5(%arg0: i32, %arg1: i32, %arg2: i32) -> (i32, i32) {
    %c0_i32 = arith.constant 0 : i32
    %c0_i32_0 = arith.constant 0 : i32
    %c0_i32_1 = arith.constant 0 : i32
    return %c0_i32, %c0_i32_0 : i32, i32
  }
  func.func @transform_6(%arg0: i32, %arg1: i32, %arg2: i32) -> (i32, i32) {
    %c0_i32 = arith.constant 0 : i32
    %c0_i32_0 = arith.constant 0 : i32
    %c0_i32_1 = arith.constant 0 : i32
    return %c0_i32, %c0_i32_0 : i32, i32
  }
  func.func @transform_7(%arg0: i32, %arg1: i32, %arg2: i32) -> (i32, i32) {
    %c0_i32 = arith.constant 0 : i32
    %c0_i32_0 = arith.constant 0 : i32
    %c0_i32_1 = arith.constant 0 : i32
    return %c0_i32, %c0_i32_0 : i32, i32
  }
  func.func @transform_8(%arg0: i32, %arg1: i32, %arg2: i32) -> (i32, i32, i32) {
    %c0_i32 = arith.constant 0 : i32
    %c0_i32_0 = arith.constant 0 : i32
    return %arg0, %arg1, %c0_i32 : i32, i32, i32
  }
}

</mosaic_0001>

<bundles_post_ra>
// kernel: tpu_custom_call.1
= control target key start
LH: loop header
LB: loop body
LE: loop exit
PB: predicated region body
PF: predicated region fallthrough
CT: control target
= control target key end

     0   :  { %s1817_s0 = inlined_call_operand.hbm [shape: bf16[2,8,32], index: 0, kind: input, shape index: {}]   ;;  %s1818_s1 = inlined_call_operand.hbm [shape: bf16[2,8,32], index: 1, kind: input, shape index: {}]   ;;  %s1819_s2 = inlined_call_operand.vmem [shape: bf16[32,32], index: 2, kind: input, shape index: {}]   ;;  %s1820_s3 = inlined_call_operand.vmem [shape: f32[1,32], index: 3, kind: input, shape index: {}]   ;;  %s1821_s4 = inlined_call_operand.vmem [shape: bf16[32,16], index: 4, kind: input, shape index: {}]   ;;  %s1822_s5 = inlined_call_operand.vmem [shape: f32[1,16], index: 5, kind: input, shape index: {}]   ;;  %s1823_s6 = inlined_call_operand.vmem [shape: bf16[32,32], index: 6, kind: input, shape index: {}]   ;;  %s1824_s7 = inlined_call_operand.vmem [shape: f32[1,32], index: 7, kind: input, shape index: {}]   ;;  %s1825_s8 = inlined_call_operand.hbm [shape: f32[2,8,32], index: 8, kind: output, shape index: {}]  }
   0x1   :  { %1832 = sst [smem:[#allocation17_spill]] %s1817_s0 }
   0x2   :  { %13 = vsyncpa [#allocation7], 0 }
   0x3   :  { %15 = vsyncpa [#allocation7 + $0x1], 0 }
   0x4   :  { %16 = vsyncpa [#allocation10], 0 }
   0x5   :  { %18 = vsyncpa [#allocation10 + $0x1], 0 }
   0x6   :  { %19 = vsyncpa [#allocation8], 0 }
   0x7   :  { %21 = vsyncpa [#allocation8 + $0x1], 0  ;;  %s1485_s27 = smov 0   ;;  %s1487_s28 = smov 0  }
   0x8   :  { %s1489_s29 = smov 0   ;;  %s1491_s30 = smov 0  }
   0x9   :  { %s1493_s9 = smov 0   ;;  %s1495_s10 = smov 0  }
   0xa LB: > { %1833 = sst [smem:[#allocation15_spill]] %s1420_s9  ;;  %s1083_s11 = sadd.s32 4294967295, %s1424_s10   ;;  %s1424_s10 = sphi %s1495_s10, %s27_s10   ;;  %s1420_s9 = sphi %s1493_s9, %s1852_s9   ;;  %s1416_s30 = sphi %s1491_s30, %s1851_s30   ;;  %s1412_s29 = sphi %s1489_s29, %s1855_s29   ;;  %s1408_s28 = sphi %s1487_s28, %s1854_s28   ;;  %s1404_s27 = sphi %s1485_s27, %s1853_s27  }
   0xb   : > { %s1084_s12 = sadd.s32 4294967294, %s1424_s10   ;;  %s46_s13 = sadd.s32 1, %s1420_s9 }
   0xc   : > { %s55_s14 = sadd.s32 1, %s1412_s29  ;;  %p48_p0 = scmp.ge.s32.totalorder %s46_s13, 2 }
   0xd   : > { %p62_p1 = scmp.ne.s32.totalorder %s1412_s29, %s1408_s28  ;;  %p63_p2 = scmp.eq.s32.totalorder %s1424_s10, 0 }
   0xe   : > { %p68_p3 = scmp.ne.s32.totalorder %s1408_s28, %s1404_s27  ;;  %s1857_s13 = smov (%p48_p0, %s46_s13), 0 }
   0xf   : > { %1834 = sst [smem:[#allocation16_spill]] %s1857_s13  ;;  %p1526_p4 = por %p63_p2, %p62_p1 }
  0x10   : > { %p69_p5 = scmp.eq.s32.totalorder %s1083_s11, 0  ;;  %s50_s16 = ssub.s32 %s1420_s9, %s1857_s13 }
  0x11   : > { %p248_p6 = scmp.eq.s32.totalorder %s1083_s11, 1  ;;  %p53_p7 = scmp.eq.s32.totalorder %s50_s16, 0 }
  0x12   : > { %p1532_p8 = por %p69_p5, %p68_p3  ;;  %p254_p10 = scmp.eq.s32.totalorder %s1084_s12, 1 }
  0x13   : > { %p1536_p9 = por %p248_p6, %p62_p1  ;;  %p1185_p13 = scmp.lt.s32.totalorder %s1424_s10, 2 }
  0x14   : > { %s1836_s17 = scalar_select %p1532_p8, 1, 0 }
  0x15   : > { %s1837_s18 = scalar_select %p1536_p9, 1, 0 }
  0x16   : > { %s1541_s19 = scalar_select %p53_p7, %s1412_s29, %s55_s14  }
  0x17   : > { %p1543_p11 = por %p254_p10, %p68_p3  ;;  %s1550_s21 = sand.u32 1, %s1412_s29  }
  0x18   : > { %s1826_s22 = sshll.u32 %s1550_s21, 2  ;;  %s1827_s23 = sshll.u32 %s1420_s9, 6 }
  0x19   : > { %s1838_s20 = scalar_select %p1543_p11, 1, 0 }
  0x1a   : > { %s1839_s0 = sld [smem:[#allocation17_spill]]  ;;  %s296_s11 = scalar_lea.vmem [#allocation6], %s1826_s22 }
  0x1b   : > { %s304_s12 = sshll.u32 %s296_s11, 4  ;;  %p1567_p0 = pnand %p1185_p13, %p1526_p4  ;;  %s1563_s12 = int_to_ptr.vmem [resolvable:$true] %s304_s12 }
  0x1c   : > { %s293_s16 = scalar_lea.sflag [#allocation7], %s1550_s21 }
  0x1d   : > { %p1280_p5 = pneg %p1567_p0 }
  0x20   : > { %s1559_s26 = scalar_lea.hbm %s1839_s0, %s1827_s23  ;;  %s1283_s15 = scalar_lea.hbm %s1839_s0, 128 }
  0x21   : > { %s1278_s24 = scalar_lea.hbm %s1559_s26, 64  ;;  %p1284_p4 = scmp.lt.u32.totalorder %s1559_s26, %s1839_s0 }
  0x22   : > { %p1279_p3 = scmp.ne.s32.totalorder %s1559_s26, %s1278_s24  ;;  %p1285_p10 = scmp.lt.u32.totalorder %s1283_s15, %s1278_s24 }
  0x23   : > { %p1287_p12 = scmp.lt.u32.totalorder %s1278_s24, %s1559_s26 }
  0x24   : > { %p1281_p6 = pnand %p1280_p5, %p1279_p3  ;;  %p1286_p13 = por %p1285_p10, %p1284_p4 }
  0x26   : > { %p1282_p7 = pneg %p1281_p6  ;;  %p1288_p1 = por %p1287_p12, %p1286_p13 }
  0x28   : > { %p1289_p2 = pnand %p1288_p1, %p1282_p7 }
  0x2a   : > { %1292 = shalt.err (!%p1289_p2)
}
  0x2b   : > { %s1293_s13 = scalar_lea.vmem %s1563_s12, 64  ;;  %s1426_s25 = smov [#allocation6]  }
  0x2c   : > { %p1294_p3 = scmp.ne.s32.totalorder %s1563_s12, %s1293_s13  ;;  %s1298_s11 = sshll.u32 %s1426_s25, 4  ;;  %s1299_s11 = int_to_ptr.vmem [resolvable:$false] %s1298_s11 }
  0x2d   : > { %s1300_s22 = scalar_lea.vmem %s1299_s11, 128  ;;  %p1301_p9 = scmp.lt.s32.totalorder %s1563_s12, %s1299_s11 }
  0x2e   : > { %p1296_p6 = pnand %p1294_p3, %p1280_p5  ;;  %p1302_p4 = scmp.lt.s32.totalorder %s1300_s22, %s1293_s13 }
  0x30   : > { %p1297_p11 = pneg %p1296_p6  ;;  %p1303_p10 = por %p1302_p4, %p1301_p9 }
  0x32   : > { %p1304_p12 = pnand %p1303_p10, %p1297_p11 }
  0x34   : > { %1307 = shalt.err (!%p1304_p12)
}
  0x35   : > { %1177 = dma.hbm_to_vmem [thread:$0]  (!%p1567_p0), %s1559_s26, 64, %s1563_s12, %s293_s16  }
  0x36   : > { %p1841_p1 = scmp.lt.s32.totalorder %s1424_s10, 3  ;;  %p1842_p2 = scmp.ge.s32.totalorder %s1424_s10, 1 }
  0x37   : > { %s1844_s13 = sshll.u32 %s1420_s9, 6  ;;  %s1845_s11 = sshll.u32 %s1550_s21, 2 }
  0x38   : > { %p1603_p7 = pnand %p1842_p2, %p1841_p1  ;;  %s1612_s25 = scalar_lea.hbm %s1818_s1, %s1844_s13 }
  0x39   : > { %s315_s22 = scalar_lea.vmem [#allocation9], %s1845_s11  ;;  %s312_s26 = scalar_lea.sflag [#allocation10], %s1550_s21 }
  0x3a   : > { %s1843_s23 = scalar_select %p1603_p7, 1, 0 }
  0x3b   : > { %s323_s0 = sshll.u32 %s315_s22, 4  ;;  %s1308_s12 = scalar_lea.hbm %s1612_s25, 64  ;;  %s324_s0 = int_to_ptr.vmem [resolvable:$true] %s323_s0 }
  0x3c   : > { %p1309_p9 = scmp.ne.s32.totalorder %s1612_s25, %s1308_s12  ;;  %s1313_s13 = scalar_lea.hbm %s1818_s1, 128 }
  0x3d   : > { %p1314_p3 = scmp.lt.u32.totalorder %s1612_s25, %s1818_s1  ;;  %p1315_p6 = scmp.lt.u32.totalorder %s1313_s13, %s1308_s12 }
  0x3e   : > { %p1311_p11 = pnand %p1309_p9, %p1280_p5  ;;  %p1317_p10 = scmp.lt.u32.totalorder %s1308_s12, %s1612_s25 }
  0x3f   : > { %p1316_p4 = por %p1315_p6, %p1314_p3 }
  0x40   : > { %p1312_p13 = pneg %p1311_p11 }
  0x41   : > { %p1318_p12 = por %p1317_p10, %p1316_p4 }
  0x43   : > { %p1319_p1 = pnand %p1318_p12, %p1312_p13 }
  0x45   : > { %1322 = shalt.err (!%p1319_p1)
}
  0x46   : > { %s1323_s21 = scalar_lea.vmem %s324_s0, 64  ;;  %s1427_s11 = smov [#allocation9]  }
  0x47   : > { %p1324_p2 = scmp.ne.s32.totalorder %s324_s0, %s1323_s21  ;;  %s1328_s9 = sshll.u32 %s1427_s11, 4  ;;  %s1329_s9 = int_to_ptr.vmem [resolvable:$false] %s1328_s9 }
  0x48   : > { %s1330_s22 = scalar_lea.vmem %s1329_s9, 128  ;;  %p1331_p8 = scmp.lt.s32.totalorder %s324_s0, %s1329_s9 }
  0x49   : > { %p1326_p9 = pnand %p1324_p2, %p1280_p5  ;;  %p1332_p7 = scmp.lt.s32.totalorder %s1330_s22, %s1323_s21 }
  0x4b   : > { %p1327_p11 = pneg %p1326_p9  ;;  %p1333_p3 = por %p1332_p7, %p1331_p8 }
  0x4d   : > { %p1334_p6 = pnand %p1333_p3, %p1327_p11 }
  0x4f   : > { %1337 = shalt.err (!%p1334_p6)
}
  0x50   : > { %1180 = dma.hbm_to_vmem [thread:$0]  (!%p1567_p0), %s1612_s25, 64, %s324_s0, %s312_s26  }
  0x51   : > { %p1846_p13 = scmp.ne.s32.totalorder %s1843_s23, 0 }
  0x52   : > { %s1639_s12 = sand.u32 (!%p1846_p13), 1, %s1408_s28   ;;  %p1847_p5 = scmp.ne.s32.totalorder (!%p1846_p13), %s1836_s17, 0 }
  0x53   : > { %332 = sbr.rel (%p1846_p13) target bundleno = 1607 (0x647), region = 52  ;;  %s1092_s16 = sshll.u32 (!%p1846_p13), %s1639_s12, 2 }
  0x54   : > { %s335_s13 = scalar_lea.sflag (!%p1846_p13), [#allocation7], %s1639_s12  ;;  %s338_s24 = scalar_lea.vmem (!%p1846_p13), [#allocation6], %s1092_s16 }
  0x5a   : > { %1391 = dma.done.wait (%p1847_p5), %s335_s13, 64  }
  0x5b   : > { %1393 = vsyncadd (%p1847_p5), %s335_s13, 4294967232  ;;  %s344_s0 = scalar_lea.sflag [#allocation10], %s1639_s12  ;;  %s347_s14 = scalar_lea.vmem [#allocation9], %s1092_s16 }
  0x5c   : > { %1395 = dma.done.wait (%p1847_p5), %s344_s0, 64  }
  0x5d   : > { %1397 = vsyncadd (%p1847_p5), %s344_s0, 4294967232  ;;  %v1428_v0 = vmov 0.0   ;;  %vm1429_vm0 = vmmov 0   ;;  %v1248_v1 = vld [vmem:[%s1819_s2] sm:$0xff]   ;;  %v1249_v2 = vld [vmem:[%s1819_s2 + $0x8] sm:$0xff]   ;;  %vm414_vm1 = vcmask 261120   ;;  %v569_v30 = vlaneseq }
  0x5e   : > { %1130 = vmatprep.subr.bf16.mxu0 %v1428_v0  ;;  %1134 = vmatprep.mubr.msk.bf16.mxu0 %vm1429_vm0, %v1428_v0  ;;  %v1250_v3 = vld [vmem:[%s1821_s4] sm:$0xff]   ;;  %v1251_v4 = vld [vmem:[%s1821_s4 + $0x8] sm:$0xff]   ;;  %v390_v5 = vld [vmem:[%s338_s24] sm:$0xf]  ;;  %vm486_vm2 = vcmask 64512   ;;  %vm460_vm3 = vcmask 60416  }
  0x5f   : > { %1138 = vmatprep.subr.bf16.mxu1 %v1428_v0  ;;  %1142 = vmatprep.mubr.msk.bf16.mxu1 %vm1429_vm0, %v1428_v0  ;;  %v498_v6 = vld [vmem:[%s347_s14] sm:$0xf]  ;;  %487 = vst.msk [vmem:[#allocation5] sm:$0xff] %vm486_vm2, %v1428_v0  ;;  %488 = vst.msk [vmem:[#allocation5 + $0x8] sm:$0xff] %vm486_vm2, %v1428_v0  ;;  %v1095_v7 = vld [vmem:[%s1820_s3] ss:$0 sm:$0xff] }
  0x60   : > { %1131 = vmatpush3.bf16.msra.mxu0 %v1248_v1  ;;  %1139 = vmatpush3.bf16.msra.mxu1 %v1250_v3  ;;  %489 = vst.msk [vmem:[#allocation5 + $0x10] sm:$0xff] %vm486_vm2, %v1428_v0  ;;  %490 = vst.msk [vmem:[#allocation5 + $0x18] sm:$0xff] %vm486_vm2, %v1428_v0  ;;  %v1099_v11 = vld [vmem:[%s1822_s5] ss:$0 sm:$0xff]  ;;  %s1430_s0 = smov 104   ;;  %s1431_s14 = smov 120  }
  0x61   : > { %1132 = vmatprep.subr.bf16.mxu0 %v1428_v0  ;;  %1140 = vmatprep.subr.bf16.mxu1 %v1428_v0  ;;  %s1432_s23 = smov 112   ;;  %vm467_vm4 = vcmask 64516   ;;  %vm477_vm5 = vcmask 7168   ;;  %v1433_v29 = vmov -inf   ;;  %v570_v31 = vshrl.u32 %v569_v30, 7  ;;  %s1436_s21 = smov 16  }
  0x62   : > { %478 = vst.msk [vmem:[#allocation3] sm:$0xff] %vm477_vm5, %v1433_v29  ;;  %479 = vst.msk [vmem:[#allocation3 + $0x8] sm:$0xff] %vm477_vm5, %v1433_v29  ;;  %v574_v32 = vand.u32 127, %v569_v30  ;;  %v1434_v33 = vmov -1e+30   ;;  %v1435_v47 = vmov 0  }
  0x63   : > { %480 = vst.msk [vmem:[#allocation3 + $0x10] sm:$0xff] %vm477_vm5, %v1433_v29  ;;  %481 = vst.msk [vmem:[#allocation3 + $0x18] sm:$0xff] %vm477_vm5, %v1433_v29  ;;  %1246 = vset.pattern.permute.xlu0 %v1435_v47  ;;  %1247 = vset.pattern.permute.xlu1 %v1435_v47  ;;  %vm770_vm7 = vcmask 1043456   ;;  %s1437_s11 = smov 8   ;;  %s1438_s9 = smov 24   ;;  %vm888_vm8 = vcmask 130048  }
  0x64   : > { %1133 = vmatpush3.bf16.msra.mxu0 %v1249_v2  ;;  %1141 = vmatpush3.bf16.msra.mxu1 %v1251_v4  ;;  %482 = vst.msk [vmem:[#allocation4] sm:$0xff] %vm477_vm5, %v1428_v0  ;;  %483 = vst.msk [vmem:[#allocation4 + $0x8] sm:$0xff] %vm477_vm5, %v1428_v0  ;;  %vm577_vm6 = vcmp.ge.s32.totalorder %v570_v31, %v574_v32  ;;  %vm890_vm9 = vcmask 195584   ;;  %s1094_s22 = sshll.u32 %s1639_s12, 3  ;;  %s1112_s24 = sshll.u32 %s1416_s30, 7 }
  0x65   : > { %484 = vst.msk [vmem:[#allocation4 + $0x10] sm:$0xff] %vm477_vm5, %v1428_v0  ;;  %485 = vst.msk [vmem:[#allocation4 + $0x18] sm:$0xff] %vm477_vm5, %v1428_v0  ;;  %v578_v34 = vsel %vm577_vm6, 0.0, %v1434_v33  ;;  %s1767_s26 = scalar_lea.hbm %s1825_s8, %s1112_s24  ;;  %s962_s30 = scalar_lea.sflag [#allocation8], %s1639_s12 }
  0x66   : > { %p1848_p0 = scmp.ne.s32.totalorder %s1837_s18, 0  ;;  %s1439_s15 = smov [#allocation11]  }
  0x67   : > { %1135 = vmatmul.mubr.msk.bf16.vlgmr.msra.gmra.mrb[0].mxu0 %vm414_vm1, %v390_v5  ;;  %1143 = vmatmul.mubr.msk.bf16.vlgmr.msra.gmra.mrb[0].mxu1 %vm414_vm1, %v498_v6 }
  0x69   : > { %v1718_v48 = vld [vmem:[#allocation3] sm:$0xff]  ;;  %v639_v50 = vld [vmem:[#allocation3 + $0x8] sm:$0xff] }
  0x6a   : > { %v641_v53 = vld [vmem:[#allocation3 + $0x18] sm:$0xff]  ;;  %v640_v57 = vld [vmem:[#allocation3 + $0x10] sm:$0xff] }
  0x6c   : > { %v704_v32 = vld [vmem:[#allocation4 + $0x10] sm:$0xff] }
 0x13a   : > { %v452_v8 = vpop.f32.mrb[0].mxu0  ;;  %v560_v15 = vpop.f32.mrb[0].mxu1 }
 0x13b   : > { %v453_v9 = vadd.f32 %v1095_v7, %v452_v8  ;;  %v1136_v10 = vpop.f32.mrb[1].mxu0  ;;  %v561_v16 = vadd.f32 %v1099_v11, %v560_v15  ;;  %v1144_v17 = vpop.f32.mrb[1].mxu1 }
 0x13c   : > { %v455_v12 = vpop.f32.mrb[2].mxu0  ;;  %v563_v19 = vpop.f32.mrb[2].mxu1 }
 0x13d   : > { %v458_v13 = vmul.f32 0.35355338, %v453_v9  ;;  %v1137_v14 = vpop.f32.mrb[3].mxu0  ;;  %v1688_v20 = vpack.c.bf16 %v561_v16, %v561_v16  ;;  %v1145_v21 = vpop.f32.mrb[3].mxu1 }
 0x13f   : > { %v459_v18 = vpack.c.bf16 %v458_v13, %v458_v13  ;;  %1166 = vmatprep.subr.msk.bf16.mxu0 %vm486_vm2, %v1688_v20  ;;  %v587_v23 = vsel %vm486_vm2, %v1688_v20, 0 }
 0x140   : > { %1147 = vmatpush3.bf16.xpose.msra.mxu0 %v587_v23 }
 0x141   : > { %v463_v22 = vrot.slane %v459_v18, 4  ;;  %461 = vst.msk [vmem:[#allocation2] sm:$0xf] %vm460_vm3, %v459_v18  ;;  %1158 = vmatprep.subr.bf16.mxu0 %v1428_v0 }
 0x143   : > { %473 = vrot.lane.b32.xlu1 %v463_v22, %s1430_s0  ;;  %464 = vrot.lane.b32.xlu0 %v463_v22, %s1431_s14  ;;  %s384_s0 = scalar_lea.vmem [#allocation11], %s1094_s22 }
 0x147   : > { %469 = vrot.lane.b32.xlu0 %v459_v18, %s1432_s23 }
 0x1b5   : > { %v474_v24 = vpop.permute.xlu1 %473  ;;  %v465_v25 = vpop.permute.xlu0 %464 }
 0x1b6   : > { %476 = vst.msk [vmem:[#allocation2 + $0x8] sm:$0xf0] %vm467_vm4, %v474_v24  ;;  %468 = vst.msk [vmem:[#allocation2] sm:$0xf0] %vm467_vm4, %v465_v25 }
 0x1b9   : > { %v470_v26 = vpop.permute.xlu0 %469 }
 0x1ba   : > { %472 = vst.msk [vmem:[#allocation2 + $0x8] sm:$0xf] %vm460_vm3, %v470_v26 }
 0x1bd   : > { %v567_v27 = vld [vmem:[#allocation2] sm:$0xff] }
 0x1be   : > { %1148 = vmatprep.mubr.msk.bf16.mxu0 %vm486_vm2, %v567_v27 }
 0x1c1   : > { %v568_v28 = vld [vmem:[#allocation2 + $0x8] sm:$0xff] }
 0x1c2   : > { %1149 = vmatmul.mubr.msk.bf16.vlgmr.msra.gmra.mrb[4].mxu0 %vm486_vm2, %v568_v28 }
 0x1c3   : > { %1162 = vmatprep.mubr.msk.bf16.mxu0 %vm1429_vm0, %v1428_v0 }
 0x295   : > { %v1150_v35 = vpop.f32.mrb[4].mxu0 }
 0x296   : > { %v623_v36 = vpop.f32.mrb[5].mxu0  ;;  %v632_v43 = vadd.f32 %v1150_v35, %v578_v34  ;;  %v703_v35 = vld [vmem:[#allocation4 + $0x8] sm:$0xff] }
 0x297   : > { %v624_v37 = vadd.f32 %v623_v36, %v578_v34  ;;  %v1151_v38 = vpop.f32.mrb[6].mxu0 }
 0x298   : > { %v626_v39 = vpop.f32.mrb[7].mxu0  ;;  %v635_v40 = vadd.f32 %v1151_v38, %v578_v34  ;;  %v648_v46 = vsel %vm486_vm2, %v632_v43, -inf }
 0x299   : > { %v627_v41 = vadd.f32 %v626_v39, %v578_v34  ;;  %v642_v42 = vsel %vm486_vm2, %v624_v37, -inf  ;;  %v705_v39 = vld [vmem:[#allocation4 + $0x18] sm:$0xff] }
 0x29a   : > { %643 = vmax.xlane.f32.xlu1 %v642_v42  ;;  %v651_v45 = vsel %vm486_vm2, %v635_v40, -inf }
 0x29b   : > { %v645_v44 = vsel %vm486_vm2, %v627_v41, -inf }
 0x29c   : > { %646 = vmax.xlane.f32.xlu0 %v645_v44  ;;  %v702_v44 = vld [vmem:[#allocation4] sm:$0xff] }
 0x29e   : > { %652 = vmax.xlane.f32.xlu1 %v651_v45 }
 0x2a0   : > { %649 = vmax.xlane.f32.xlu0 %v648_v46 }
 0x327   : > { %v644_v49 = vpop.xlane.xlu1 %643 }
 0x328   : > { %v1721_v51 = vmax.f32 %v1718_v48, %v644_v49 }
 0x329   : > { %v647_v52 = vpop.xlane.xlu0 %646 }
 0x32a   : > { %v658_v54 = vsub.f32 %v1718_v48, %v1721_v51  ;;  %831 = vst.msk [vmem:[#allocation3] sm:$0xff] %vm477_vm5, %v1721_v51  ;;  %v655_v55 = vmax.f32 %v639_v50, %v647_v52  ;;  %672 = vperm.xlu0 %1246, %v1721_v51  }
 0x32b   : > { %v653_v56 = vpop.xlane.xlu1 %652 }
 0x32c   : > { %v659_v58 = vsub.f32 %v639_v50, %v655_v55  ;;  %832 = vst.msk [vmem:[#allocation3 + $0x8] sm:$0xff] %vm477_vm5, %v655_v55  ;;  %v657_v59 = vmax.f32 %v641_v53, %v653_v56  ;;  %v662_v31 = vmul.f32 1.442695, %v658_v54 }
 0x32d   : > { %v650_v60 = vpop.xlane.xlu0 %649 }
 0x32e   : > { %v661_v61 = vsub.f32 %v641_v53, %v657_v59  ;;  %834 = vst.msk [vmem:[#allocation3 + $0x18] sm:$0xff] %vm477_vm5, %v657_v59  ;;  %v656_v62 = vmax.f32 %v640_v57, %v650_v60  ;;  %v664_v26 = vmul.f32 1.442695, %v659_v58  ;;  %v733_v58 = vld [vmem:[#allocation5 + $0x10] sm:$0xff]  ;;  %v734_v60 = vld [vmem:[#allocation5 + $0x18] sm:$0xff] }
 0x330   : > { %v660_v63 = vsub.f32 %v640_v57, %v656_v62  ;;  %833 = vst.msk [vmem:[#allocation3 + $0x10] sm:$0xff] %vm477_vm5, %v656_v62  ;;  %682 = vperm.xlu1 %1247, %v656_v62   ;;  %v668_v27 = vmul.f32 1.442695, %v661_v61 }
 0x332   : > { %v666_v22 = vmul.f32 1.442695, %v660_v63  ;;  %v732_v63 = vld [vmem:[#allocation5 + $0x8] sm:$0xff] }
 0x334   : > { %677 = vperm.xlu1 %1247, %v655_v55  }
 0x338   : > { %687 = vperm.xlu1 %1247, %v657_v59  }
 0x33c   : > { %762 = vrot.lane.b32.xlu1 %v1688_v20, %s1431_s14  ;;  %s976_s14 = sshll.u32 %s384_s0, 4  ;;  %s1769_s14 = int_to_ptr.vmem [resolvable:$true] %s976_s14 }
 0x33d   : > { %s1338_s17 = scalar_lea.vmem %s1769_s14, 128 }
 0x33e   : > { %p1339_p8 = scmp.ne.s32.totalorder %s1769_s14, %s1338_s17 }
 0x340   : > { %p1340_p7 = pnand %p1339_p8, %p1848_p0 }
 0x342   : > { %p1341_p4 = pneg %p1340_p7 }
 0x3a9   : > { %v673_v1 = vpop.permute.xlu0 %672 }
 0x3aa   : > { %v690_v2 = vsub.f32 %v624_v37, %v673_v1 }
 0x3ac   : > { %v694_v6 = vmul.f32 1.442695, %v690_v2 }
 0x3af   : > { %v683_v3 = vpop.permute.xlu1 %682 }
 0x3b0   : > { %v692_v4 = vsub.f32 %v632_v43, %v683_v3 }
 0x3b2   : > { %v698_v5 = vmul.f32 1.442695, %v692_v4 }
 0x3b3   : > { %v678_v7 = vpop.permute.xlu1 %677 }
 0x3b4   : > { %1254 = vpow2.f32 %v698_v5  ;;  %v691_v8 = vsub.f32 %v627_v41, %v678_v7 }
 0x3b5   : > { %1256 = vpow2.f32 %v694_v6 }
 0x3b6   : > { %v696_v9 = vmul.f32 1.442695, %v691_v8 }
 0x3b7   : > { %v688_v10 = vpop.permute.xlu1 %687 }
 0x3b8   : > { %1258 = vpow2.f32 %v696_v9  ;;  %v693_v11 = vsub.f32 %v635_v40, %v688_v10  ;;  %v1252_v10 = vld [vmem:[%s1823_s6] sm:$0xff]  }
 0x3b9   : > { %1159 = vmatpush3.bf16.msra.mxu0 %v1252_v10 }
 0x3ba   : > { %v700_v12 = vmul.f32 1.442695, %v693_v11  ;;  %1160 = vmatprep.subr.bf16.mxu0 %v1428_v0  ;;  %v1253_v11 = vld [vmem:[%s1823_s6 + $0x8] sm:$0xff]  }
 0x3bb   : > { %v763_v13 = vpop.permute.xlu1 %762 }
 0x3bc   : > { %1260 = vpow2.f32 %v700_v12  ;;  %v772_v14 = vsel %vm770_vm7, %v763_v13, 0  ;;  %1167 = vmatprep.subr.msk.bf16.mxu1 %vm770_vm7, %v763_v13 }
 0x3bd   : > { %1153 = vmatpush3.bf16.msra.mxu1 %v772_v14  ;;  %1262 = vpow2.f32 %v666_v22  ;;  %1161 = vmatpush3.bf16.msra.mxu0 %v1253_v11 }
 0x3be   : > { %v1255_v15 = vpop.eup %1254  ;;  %1264 = vpow2.f32 %v664_v26 }
 0x3bf   : > { %v716_v16 = vsel %vm486_vm2, %v1255_v15, 0.0  ;;  %v1257_v17 = vpop.eup %1256  ;;  %1266 = vpow2.f32 %v668_v27 }
 0x3c0   : > { %717 = vadd.xlane.f32.xlu0 %v716_v16  ;;  %v710_v25 = vsel %vm486_vm2, %v1257_v17, 0.0  ;;  %1268 = vpow2.f32 %v662_v31 }
 0x3c2   : > { %v1259_v18 = vpop.eup %1258 }
 0x3c3   : > { %v713_v19 = vsel %vm486_vm2, %v1259_v18, 0.0  ;;  %v759_v20 = vpack.c.bf16 %v1259_v18, %v1257_v17 }
 0x3c4   : > { %714 = vadd.xlane.f32.xlu1 %v713_v19 }
 0x3c5   : > { %1154 = vmatprep.mubr.msk.bf16.mxu1 %vm486_vm2, %v759_v20 }
 0x3c6   : > { %v1261_v21 = vpop.eup %1260 }
 0x3c7   : > { %v719_v23 = vsel %vm486_vm2, %v1261_v21, 0.0  ;;  %v760_v24 = vpack.c.bf16 %v1261_v21, %v1255_v15  ;;  %v1263_v28 = vpop.eup %1262  ;;  %v731_v15 = vld [vmem:[#allocation5] sm:$0xff] }
 0x3c8   : > { %720 = vadd.xlane.f32.xlu1 %v719_v23  ;;  %v1265_v29 = vpop.eup %1264  ;;  %v708_v33 = vmul.f32 %v1263_v28, %v704_v32 }
 0x3c9   : > { %1155 = vmatmul.mubr.msk.bf16.vlgmr.msra.gmra.mrb[4].mxu1 %vm486_vm2, %v760_v24  ;;  %v1267_v30 = vpop.eup %1266  ;;  %v707_v37 = vmul.f32 %v1265_v29, %v703_v35 }
 0x3ca   : > { %v709_v41 = vmul.f32 %v1267_v30, %v705_v39  ;;  %v1269_v42 = vpop.eup %1268 }
 0x3cb   : > { %v706_v47 = vmul.f32 %v1269_v42, %v702_v44 }
 0x3cc   : > { %711 = vadd.xlane.f32.xlu1 %v710_v25 }
 0x3d6   : > { %747 = vperm.xlu0 %1246, %v1263_v28  }
 0x3dd   : > { %742 = vperm.xlu1 %1247, %v1265_v29  }
 0x3e1   : > { %752 = vperm.xlu1 %1247, %v1267_v30  }
 0x44d   : > { %v718_v34 = vpop.xlane.xlu0 %717 }
 0x44e   : > { %v724_v36 = vadd.f32 %v718_v34, %v708_v33  ;;  %v1107_v34 = vld [vmem:[%s1824_s7] ss:$0 sm:$0xff] }
 0x450   : > { %729 = vst.msk [vmem:[#allocation4 + $0x10] sm:$0xff] %vm477_vm5, %v724_v36 }
 0x451   : > { %v715_v38 = vpop.xlane.xlu1 %714 }
 0x452   : > { %v723_v40 = vadd.f32 %v715_v38, %v707_v37 }
 0x454   : > { %728 = vst.msk [vmem:[#allocation4 + $0x8] sm:$0xff] %vm477_vm5, %v723_v40 }
 0x455   : > { %v721_v43 = vpop.xlane.xlu1 %720  ;;  %v748_v59 = vpop.permute.xlu0 %747 }
 0x456   : > { %v725_v45 = vadd.f32 %v721_v43, %v709_v41  ;;  %v757_v62 = vmul.f32 %v748_v59, %v733_v58 }
 0x457   : > { %v840_v46 = vld [vmem:[#allocation4 + $0x10] sm:$0xff] }
 0x458   : > { %730 = vst.msk [vmem:[#allocation4 + $0x18] sm:$0xff] %vm477_vm5, %v725_v45  ;;  %1270 = vrcp.f32 %v840_v46 }
 0x459   : > { %v712_v48 = vpop.xlane.xlu1 %711 }
 0x45a   : > { %v722_v49 = vadd.f32 %v712_v48, %v706_v47 }
 0x45b   : > { %v839_v50 = vld [vmem:[#allocation4 + $0x8] sm:$0xff] }
 0x45c   : > { %727 = vst.msk [vmem:[#allocation4] sm:$0xff] %vm477_vm5, %v722_v49  ;;  %1272 = vrcp.f32 %v839_v50 }
 0x45d   : > { %v743_v57 = vpop.permute.xlu1 %742 }
 0x45e   : > { %v756_v5 = vmul.f32 %v743_v57, %v732_v63 }
 0x45f   : > { %v841_v51 = vld [vmem:[#allocation4 + $0x18] sm:$0xff] }
 0x460   : > { %1274 = vrcp.f32 %v841_v51 }
 0x461   : > { %v753_v61 = vpop.permute.xlu1 %752 }
 0x462   : > { %v1271_v52 = vpop.eup %1270  ;;  %v758_v2 = vmul.f32 %v753_v61, %v734_v60 }
 0x463   : > { %862 = vperm.xlu0 %1246, %v1271_v52   ;;  %v838_v53 = vld [vmem:[#allocation4] sm:$0xff] }
 0x464   : > { %1276 = vrcp.f32 %v838_v53 }
 0x466   : > { %v1273_v54 = vpop.eup %1272 }
 0x467   : > { %737 = vperm.xlu0 %1246, %v1269_v42   ;;  %857 = vperm.xlu1 %1247, %v1273_v54  }
 0x46a   : > { %v1275_v55 = vpop.eup %1274 }
 0x46b   : > { %867 = vperm.xlu1 %1247, %v1275_v55  }
 0x46e   : > { %v1277_v56 = vpop.eup %1276 }
 0x46f   : > { %852 = vperm.xlu1 %1247, %v1277_v56  }
 0x49c   : > { %v1156_v1 = vpop.f32.mrb[4].mxu1 }
 0x49d   : > { %v825_v3 = vadd.f32 %v1156_v1, %v757_v62  ;;  %v808_v4 = vpop.f32.mrb[5].mxu1 }
 0x49e   : > { %v1157_v6 = vpop.f32.mrb[6].mxu1 }
 0x49f   : > { %829 = vst.msk [vmem:[#allocation5 + $0x10] sm:$0xff] %vm486_vm2, %v825_v3  ;;  %v826_v7 = vadd.f32 %v1157_v6, %v758_v2  ;;  %v811_v8 = vpop.f32.mrb[7].mxu1 }
 0x4a0   : > { %v824_v9 = vadd.f32 %v811_v8, %v756_v5 }
 0x4a1   : > { %830 = vst.msk [vmem:[#allocation5 + $0x18] sm:$0xff] %vm486_vm2, %v826_v7 }
 0x4a2   : > { %828 = vst.msk [vmem:[#allocation5 + $0x8] sm:$0xff] %vm486_vm2, %v824_v9 }
 0x4a6   : > { %v848_v13 = vld [vmem:[#allocation5 + $0x10] sm:$0xff] }
 0x4a8   : > { %v849_v0 = vld [vmem:[#allocation5 + $0x18] sm:$0xff] }
 0x4a9   : > { %v847_v17 = vld [vmem:[#allocation5 + $0x8] sm:$0xff] }
 0x4e2   : > { %v863_v12 = vpop.permute.xlu0 %862 }
 0x4e3   : > { %v872_v14 = vmul.f32 %v863_v12, %v848_v13 }
 0x4e5   : > { %879 = vrot.lane.b32.xlu1 %v872_v14, %s1436_s21  ;;  %s1342_s21 = sshll.u32 %s1439_s15, 4  ;;  %s1343_s21 = int_to_ptr.vmem [resolvable:$false] %s1342_s21 }
 0x4e6   : > { %v738_v16 = vpop.permute.xlu0 %737  ;;  %v858_v18 = vpop.permute.xlu1 %857  ;;  %p1345_p10 = scmp.lt.s32.totalorder %s1769_s14, %s1343_s21 }
 0x4e7   : > { %v755_v19 = vmul.f32 %v738_v16, %v731_v15  ;;  %v871_v20 = vmul.f32 %v858_v18, %v847_v17 }
 0x4e9   : > { %v823_v21 = vadd.f32 %v808_v4, %v755_v19  ;;  %875 = vrot.lane.b32.xlu0 %v871_v20, %s1437_s11  ;;  %s1344_s11 = scalar_lea.vmem %s1343_s21, 256 }
 0x4ea   : > { %v868_v22 = vpop.permute.xlu1 %867  ;;  %p1346_p12 = scmp.lt.s32.totalorder %s1344_s11, %s1338_s17 }
 0x4eb   : > { %827 = vst.msk [vmem:[#allocation5] sm:$0xff] %vm486_vm2, %v823_v21  ;;  %v873_v23 = vmul.f32 %v868_v22, %v849_v0 }
 0x4ec   : > { %p1347_p1 = por %p1346_p12, %p1345_p10 }
 0x4ed   : > { %883 = vrot.lane.b32.xlu0 %v873_v23, %s1438_s9 }
 0x4ee   : > { %v853_v25 = vpop.permute.xlu1 %852  ;;  %p1348_p2 = pnand %p1347_p1, %p1341_p4 }
 0x4f2   : > { %v846_v24 = vld [vmem:[#allocation5] sm:$0xff] }
 0x4f3   : > { %v870_v26 = vmul.f32 %v853_v25, %v846_v24 }
 0x557   : > { %v880_v29 = vpop.permute.xlu1 %879 }
 0x55b   : > { %v876_v27 = vpop.permute.xlu0 %875 }
 0x55c   : > { %v887_v28 = vsel %vm486_vm2, %v870_v26, %v876_v27 }
 0x55d   : > { %v889_v31 = vsel %vm888_vm8, %v887_v28, %v880_v29 }
 0x55f   : > { %v884_v30 = vpop.permute.xlu0 %883 }
 0x560   : > { %v891_v32 = vsel %vm890_vm9, %v889_v31, %v884_v30 }
 0x561   : > { %v892_v33 = vpack.c.bf16 %v891_v32, %v891_v32 }
 0x563   : > { %1163 = vmatmul.mubr.msk.bf16.vlgmr.msra.gmra.mrb[8].mxu0 %vm414_vm1, %v892_v33 }
 0x636   : > { %v954_v35 = vpop.f32.mrb[8].mxu0 }
 0x637   : > { %v955_v36 = vadd.f32 %v1107_v34, %v954_v35  ;;  %v1164_v37 = vpop.f32.mrb[9].mxu0 }
 0x638   : > { %v957_v38 = vpop.f32.mrb[10].mxu0 }
 0x639   : > { %v1165_v39 = vpop.f32.mrb[11].mxu0  ;;  %960 = vst.msk [vmem:[%s384_s0] sm:$0xff] %vm414_vm1, %v955_v36 }
 0x63a   : > { %1351 = shalt.err (!%p1348_p2)
}
 0x63b   : > { %s1352_s12 = scalar_lea.hbm %s1767_s26, 128  ;;  %s1356_s16 = scalar_lea.hbm %s1825_s8, 256 }
 0x63c   : > { %p1353_p9 = scmp.ne.s32.totalorder %s1767_s26, %s1352_s12  ;;  %p1357_p6 = scmp.lt.u32.totalorder %s1767_s26, %s1825_s8 }
 0x63d   : > { %p1358_p13 = scmp.lt.u32.totalorder %s1356_s16, %s1352_s12  ;;  %p1360_p8 = scmp.lt.u32.totalorder %s1352_s12, %s1767_s26 }
 0x63e   : > { %p1354_p11 = pnand %p1353_p9, %p1848_p0 }
 0x63f   : > { %p1359_p5 = por %p1358_p13, %p1357_p6 }
 0x640   : > { %p1355_p3 = pneg %p1354_p11 }
 0x641   : > { %p1361_p7 = por %p1360_p8, %p1359_p5 }
 0x643   : > { %p1362_p4 = pnand %p1361_p7, %p1355_p3 }
 0x645   : > { %1365 = shalt.err (!%p1362_p4)
}
 0x646   : > { %1172 = dma.vmem_to_hbm [thread:$0]  (%p1848_p0), %s1769_s14, 128, %s1767_s26, %s962_s30  }
 0x647 PF: > { %s988_s0 = sand.u32 1, %s1404_s27   ;;  %p1849_p10 = scmp.ne.s32.totalorder %s1838_s20, 0 }
 0x648   : > { %p1850_p12 = scmp.ge.s32.totalorder %s1424_s10, 2  ;;  %s989_s23 = scalar_lea.sflag [#allocation8], %s988_s0 }
 0x64a   : > { %p1182_p1 = pnand %p1850_p12, %p1849_p10 }
 0x64c   : > { %1399 = dma.done.wait (!%p1182_p1), %s989_s23, 128  }
 0x64d   : > { %1401 = vsyncadd (!%p1182_p1), %s989_s23, 4294967168  ;;  %s27_s10 = sadd.s32 1, %s1424_s10   ;;  %s1851_s30 = sld [smem:[#allocation15_spill]] }
 0x64e   : > { %p24_p2 = scmp.ge.s32.totalorder %s27_s10, 4   ;;  %s1852_s9 = sld [smem:[#allocation16_spill]] }
 0x64f   : > { %s1853_s27 = smov %s1408_s28  ;;  %s1854_s28 = smov %s1412_s29 }
 0x650   : > { %s1855_s29 = smov %s1541_s19  ;;  %26 = sbr.rel (!%p24_p2) target bundleno = 10 (0xa), region = 122 }
 0x657   :  { %994 = vsyncpa [#allocation7], 1 }
 0x658   :  { %996 = vsyncpa [#allocation7 + $0x1], 1 }
 0x659   :  { %997 = vsyncpa [#allocation10], 1 }
 0x65a   :  { %999 = vsyncpa [#allocation10 + $0x1], 1 }
 0x65b   :  { %1000 = vsyncpa [#allocation8], 1 }
 0x65c   :  { %1002 = vsyncpa [#allocation8 + $0x1], 1 }

</bundles_post_ra>
